<compile_context>
chip_gen: v5e
topology: v5e:2x2
jax: 0.10.0
libtpu: 0.0.40
codegen_flags: <defaults>
</compile_context>

<pallas_src>
import math
import numpy as np
import jax
import jax.numpy as jnp
from jax.experimental import pallas as pl
from jax.experimental.pallas import tpu as pltpu

KLEN = 31   # gaussian kernel size (gkern(31, 4) in the module __init__)
NSIG = 4
PAD = 15    # conv padding


def gkern_and_factor(kernlen=KLEN, nsig=NSIG):
    """Reproduce the module's gaussian kernel (no scipy) + its exact rank-1 factor."""
    interval = (2 * nsig + 1.0) / kernlen
    x = np.linspace(-nsig - interval / 2.0, nsig + interval / 2.0, kernlen + 1)
    cdf = np.array([0.5 * (1.0 + math.erf(v / math.sqrt(2.0))) for v in x])
    kern1d = np.diff(cdf)
    kernel_raw = np.sqrt(np.outer(kern1d, kern1d))
    kernel = kernel_raw / kernel_raw.sum()
    u = np.sqrt(kern1d) / np.sqrt(kern1d).sum()   # kernel == outer(u, u)
    return np.float32(kernel), np.float32(u)


def _soft_kernel(att_ref, l_ref, r_ref, x_ref, o_ref, soft_ref):
    # att_ref:  (1, H, W)    attention (single channel), f32
    # l_ref:    (H, H)       row-pass band matrix  (zero padding folded in)
    # r_ref:    (W, W)       col-pass band matrix  (zero padding folded in)
    # x_ref:    (1, Ct, HW)  channel tile of x, lane-dense
    # o_ref:    (1, Ct, HW)  output tile
    # soft_ref: (1, HW)      VMEM scratch holding max(minmax(conv), att), flat
    H = att_ref.shape[1]
    W = att_ref.shape[2]
    c = pl.program_id(1)

    @pl.when(c == 0)
    def _():
        a = att_ref[0]                                             # (H, W)
        # separable 31x31 gaussian conv as two MXU matmuls
        t = jnp.dot(a, r_ref[...], preferred_element_type=jnp.float32)   # (H, W)
        s = jnp.dot(l_ref[...], t, preferred_element_type=jnp.float32)   # (H, W)
        # min_max_norm over (H, W) (single-channel soft attention)
        mn = jnp.min(s)
        mx = jnp.max(s)
        s = (s - mn) * (1.0 / (mx - mn + 1e-8))
        # elementwise max with the original attention
        s = jnp.maximum(s, a)                                      # (H, W)
        # flatten row-major into the lane-dense scratch (once per batch)
        for h in range(H):
            soft_ref[:, pl.ds(h * W, W)] = s[h:h + 1, :]

    # broadcast-multiply this channel tile (lane-dense stores)
    o_ref[0] = (x_ref[0] * soft_ref[...]).astype(o_ref.dtype)


def _pick_channel_tile(C, HW, itemsize, budget_bytes=16 << 20):
    """Largest channel tile whose double-buffered x+out blocks fit the budget."""
    per_chan = 4 * HW * itemsize            # x + out, each double-buffered
    if C * per_chan <= budget_bytes:
        return C
    for ct in range(C, 0, -1):
        # tile must divide C and keep the second-minor dim (8,128)-legal
        if C % ct == 0 and ct % 8 == 0 and ct * per_chan <= budget_bytes:
            return ct
    return C  # fallback: single big tile


def soft_forward(attention, x, u):
    B, Ca, H, W = attention.shape
    assert Ca == 1, "attention must have a single channel"
    Bx, C, Hx, Wx = x.shape
    assert (Bx, Hx, Wx) == (B, H, W)
    HW = H * W

    att2d = attention[:, 0].astype(jnp.float32)        # (B, H, W)
    xf = x.reshape(B, C, HW)                           # lane-dense layout (free reshape)

    # Weight preprocessing (glue): band matrices with the zero padding folded in.
    u = np.asarray(u, np.float32)
    L = np.zeros((H, H), np.float32)
    Rc = np.zeros((W, W), np.float32)
    for h in range(H):
        for hp in range(max(0, h - PAD), min(H, h + PAD + 1)):
            L[h, hp] = u[hp - h + PAD]
    for w in range(W):
        for wp in range(max(0, w - PAD), min(W, w + PAD + 1)):
            Rc[wp, w] = u[wp - w + PAD]
    L = jnp.asarray(L)
    Rc = jnp.asarray(Rc)

    Ct = _pick_channel_tile(C, HW, jnp.dtype(x.dtype).itemsize)
    nct = C // Ct if C % Ct == 0 else 1
    if C % Ct != 0:
        Ct = C

    out = pl.pallas_call(
        _soft_kernel,
        out_shape=jax.ShapeDtypeStruct((B, C, HW), x.dtype),
        grid_spec=pltpu.PrefetchScalarGridSpec(
            num_scalar_prefetch=0,
            grid=(B, nct),
            in_specs=[
                pl.BlockSpec((1, H, W), lambda b, c: (b, 0, 0)),
                pl.BlockSpec((H, H), lambda b, c: (0, 0)),
                pl.BlockSpec((W, W), lambda b, c: (0, 0)),
                pl.BlockSpec((1, Ct, HW), lambda b, c: (b, c, 0)),
            ],
            out_specs=pl.BlockSpec((1, Ct, HW), lambda b, c: (b, c, 0)),
            scratch_shapes=[pltpu.VMEM((1, HW), jnp.float32)],
        ),
        compiler_params=pltpu.CompilerParams(
            dimension_semantics=("parallel", "arbitrary")),
    )(att2d, L, Rc, xf)
    return out.reshape(B, C, H, W)


def soft_reference(attention, x, gaussian_kernel):
    """Plain-JAX reference of the PyTorch forward."""
    k = jnp.asarray(gaussian_kernel)[None, None]         # (1,1,31,31)
    s = jax.lax.conv_general_dilated(
        attention, k, window_strides=(1, 1),
        padding=[(PAD, PAD), (PAD, PAD)],
        dimension_numbers=("NCHW", "OIHW", "NCHW"))
    mx = s.max(axis=(2, 3), keepdims=True)
    mn = s.min(axis=(2, 3), keepdims=True)
    s = (s - mn) / (mx - mn + 1e-8)
    return x * jnp.maximum(s, attention)


if __name__ == "__main__":
    B, C, H, W = 2, 4, 16, 16
    key = jax.random.PRNGKey(0)
    k1, k2 = jax.random.split(key)
    attention = jax.random.uniform(k1, (B, 1, H, W), dtype=jnp.float32)
    x = jax.random.normal(k2, (B, C, H, W), dtype=jnp.float32)

    K, u = gkern_and_factor(KLEN, NSIG)   # deterministic parameter init (as module __init__)

    out = soft_forward(attention, x, u)
    out = jax.block_until_ready(out)

    ref = soft_reference(attention, x, K)
    assert out.shape == (B, C, H, W)
    err = float(jnp.max(jnp.abs(out - ref)))
    if err < 1e-4:
        print("KERNEL_OK")
    else:
        print(f"MISMATCH max_abs_err={err}")
</pallas_src>

<mosaic_0001>
module attributes {stable_mosaic.version = 11 : i64} {
  func.func @_soft_kernel(%arg0: i32, %arg1: i32, %arg2: memref<1x16x16xf32, #tpu.memory_space<vmem>>, %arg3: memref<16x16xf32, #tpu.memory_space<vmem>>, %arg4: memref<16x16xf32, #tpu.memory_space<vmem>>, %arg5: memref<1x4x256xf32, #tpu.memory_space<vmem>>, %arg6: memref<1x4x256xf32, #tpu.memory_space<vmem>>, %arg7: memref<1x256xf32, #tpu.memory_space<vmem>>) attributes {dimension_semantics = [#tpu.dimension_semantics<parallel>, #tpu.dimension_semantics<arbitrary>], iteration_bounds = array<i64: 2, 1>, scalar_prefetch = 0 : i64, scratch_operands = 1 : i64, tpu.core_type = #tpu.core_type<tc>, window_params = [{transform_indices = @transform_0, window_bounds = array<i64: 1, 16, 16>}, {pipeline_mode = #tpu.pipeline_mode<synchronous>, transform_indices = @transform_1, window_bounds = array<i64: 16, 16>}, {pipeline_mode = #tpu.pipeline_mode<synchronous>, transform_indices = @transform_2, window_bounds = array<i64: 16, 16>}, {transform_indices = @transform_3, window_bounds = array<i64: 1, 4, 256>}, {transform_indices = @transform_4, window_bounds = array<i64: 1, 4, 256>}]} {
    %c0_i32 = arith.constant 0 : i32
    %0 = arith.cmpi eq, %arg1, %c0_i32 : i32
    %1 = arith.extui %0 : i1 to i32
    %c0_i32_0 = arith.constant 0 : i32
    %2 = arith.cmpi ne, %1, %c0_i32_0 : i32
    scf.if %2 {
      %c0_8 = arith.constant 0 : index
      %c0_9 = arith.constant 0 : index
      %c0_10 = arith.constant 0 : index
      %11 = vector.load %arg2[%c0_8, %c0_9, %c0_10] : memref<1x16x16xf32, #tpu.memory_space<vmem>>, vector<1x16x16xf32>
      %12 = vector.shape_cast %11 : vector<1x16x16xf32> to vector<16x16xf32>
      %c0_11 = arith.constant 0 : index
      %c0_12 = arith.constant 0 : index
      %13 = vector.load %arg4[%c0_11, %c0_12] : memref<16x16xf32, #tpu.memory_space<vmem>>, vector<16x16xf32>
      %cst = arith.constant dense<0.000000e+00> : vector<16x16xf32>
      %14 = tpu.matmul %12, %13, %cst {dimension_numbers = #tpu.dot_dimension_numbers<[1], [0], [0], [1], [0, 0, 1, 1], [], []>} : vector<16x16xf32>, vector<16x16xf32>, vector<16x16xf32> -> vector<16x16xf32>
      %c0_13 = arith.constant 0 : index
      %c0_14 = arith.constant 0 : index
      %15 = vector.load %arg3[%c0_13, %c0_14] : memref<16x16xf32, #tpu.memory_space<vmem>>, vector<16x16xf32>
      %cst_15 = arith.constant dense<0.000000e+00> : vector<16x16xf32>
      %16 = tpu.matmul %15, %14, %cst_15 {dimension_numbers = #tpu.dot_dimension_numbers<[1], [0], [0], [1], [0, 0, 1, 1], [], []>} : vector<16x16xf32>, vector<16x16xf32>, vector<16x16xf32> -> vector<16x16xf32>
      %17 = vector.shape_cast %16 : vector<16x16xf32> to vector<1x16x16xf32>
      %cst_16 = arith.constant dense<0x7F800000> : vector<1xf32>
      %18 = vector.multi_reduction <minimumf>, %17, %cst_16 [1, 2] : vector<1x16x16xf32> to vector<1xf32>
      %19 = vector.shape_cast %18 : vector<1xf32> to vector<1x1x1xf32>
      %20 = vector.extract %19[0, 0, 0] : f32 from vector<1x1x1xf32>
      %21 = vector.shape_cast %16 : vector<16x16xf32> to vector<1x16x16xf32>
      %cst_17 = arith.constant dense<0xFF800000> : vector<1xf32>
      %22 = vector.multi_reduction <maximumf>, %21, %cst_17 [1, 2] : vector<1x16x16xf32> to vector<1xf32>
      %23 = vector.shape_cast %22 : vector<1xf32> to vector<1x1x1xf32>
      %24 = vector.extract %23[0, 0, 0] : f32 from vector<1x1x1xf32>
      %25 = vector.broadcast %20 : f32 to vector<16x16xf32>
      %26 = arith.subf %16, %25 : vector<16x16xf32>
      %27 = arith.subf %24, %20 : f32
      %cst_18 = arith.constant 9.99999993E-9 : f32
      %28 = arith.addf %27, %cst_18 : f32
      %cst_19 = arith.constant 1.000000e+00 : f32
      %29 = arith.divf %cst_19, %28 : f32
      %30 = vector.broadcast %29 : f32 to vector<16x16xf32>
      %31 = arith.mulf %26, %30 : vector<16x16xf32>
      %32 = arith.maximumf %31, %12 : vector<16x16xf32>
      %33 = vector.extract_strided_slice %32 {offsets = [0, 0], sizes = [1, 16], strides = [1, 1]} : vector<16x16xf32> to vector<1x16xf32>
      %c0_20 = arith.constant 0 : index
      %c0_21 = arith.constant 0 : index
      %34 = vector.load %arg7[%c0_20, %c0_21] : memref<1x256xf32, #tpu.memory_space<vmem>>, vector<1x16xf32>
      tpu.vector_store %arg7[%c0_20, %c0_21], %33 {strides = array<i32>} : memref<1x256xf32, #tpu.memory_space<vmem>>, vector<1x16xf32>,
      %35 = vector.extract_strided_slice %32 {offsets = [1, 0], sizes = [1, 16], strides = [1, 1]} : vector<16x16xf32> to vector<1x16xf32>
      %c0_22 = arith.constant 0 : index
      %c16 = arith.constant 16 : index
      %36 = vector.load %arg7[%c0_22, %c16] : memref<1x256xf32, #tpu.memory_space<vmem>>, vector<1x16xf32>
      tpu.vector_store %arg7[%c0_22, %c16], %35 {strides = array<i32>} : memref<1x256xf32, #tpu.memory_space<vmem>>, vector<1x16xf32>,
      %37 = vector.extract_strided_slice %32 {offsets = [2, 0], sizes = [1, 16], strides = [1, 1]} : vector<16x16xf32> to vector<1x16xf32>
      %c0_23 = arith.constant 0 : index
      %c32 = arith.constant 32 : index
      %38 = vector.load %arg7[%c0_23, %c32] : memref<1x256xf32, #tpu.memory_space<vmem>>, vector<1x16xf32>
      tpu.vector_store %arg7[%c0_23, %c32], %37 {strides = array<i32>} : memref<1x256xf32, #tpu.memory_space<vmem>>, vector<1x16xf32>,
      %39 = vector.extract_strided_slice %32 {offsets = [3, 0], sizes = [1, 16], strides = [1, 1]} : vector<16x16xf32> to vector<1x16xf32>
      %c0_24 = arith.constant 0 : index
      %c48 = arith.constant 48 : index
      %40 = vector.load %arg7[%c0_24, %c48] : memref<1x256xf32, #tpu.memory_space<vmem>>, vector<1x16xf32>
      tpu.vector_store %arg7[%c0_24, %c48], %39 {strides = array<i32>} : memref<1x256xf32, #tpu.memory_space<vmem>>, vector<1x16xf32>,
      %41 = vector.extract_strided_slice %32 {offsets = [4, 0], sizes = [1, 16], strides = [1, 1]} : vector<16x16xf32> to vector<1x16xf32>
      %c0_25 = arith.constant 0 : index
      %c64 = arith.constant 64 : index
      %42 = vector.load %arg7[%c0_25, %c64] : memref<1x256xf32, #tpu.memory_space<vmem>>, vector<1x16xf32>
      tpu.vector_store %arg7[%c0_25, %c64], %41 {strides = array<i32>} : memref<1x256xf32, #tpu.memory_space<vmem>>, vector<1x16xf32>,
      %43 = vector.extract_strided_slice %32 {offsets = [5, 0], sizes = [1, 16], strides = [1, 1]} : vector<16x16xf32> to vector<1x16xf32>
      %c0_26 = arith.constant 0 : index
      %c80 = arith.constant 80 : index
      %44 = vector.load %arg7[%c0_26, %c80] : memref<1x256xf32, #tpu.memory_space<vmem>>, vector<1x16xf32>
      tpu.vector_store %arg7[%c0_26, %c80], %43 {strides = array<i32>} : memref<1x256xf32, #tpu.memory_space<vmem>>, vector<1x16xf32>,
      %45 = vector.extract_strided_slice %32 {offsets = [6, 0], sizes = [1, 16], strides = [1, 1]} : vector<16x16xf32> to vector<1x16xf32>
      %c0_27 = arith.constant 0 : index
      %c96 = arith.constant 96 : index
      %46 = vector.load %arg7[%c0_27, %c96] : memref<1x256xf32, #tpu.memory_space<vmem>>, vector<1x16xf32>
      tpu.vector_store %arg7[%c0_27, %c96], %45 {strides = array<i32>} : memref<1x256xf32, #tpu.memory_space<vmem>>, vector<1x16xf32>,
      %47 = vector.extract_strided_slice %32 {offsets = [7, 0], sizes = [1, 16], strides = [1, 1]} : vector<16x16xf32> to vector<1x16xf32>
      %c0_28 = arith.constant 0 : index
      %c112 = arith.constant 112 : index
      %48 = vector.load %arg7[%c0_28, %c112] : memref<1x256xf32, #tpu.memory_space<vmem>>, vector<1x16xf32>
      tpu.vector_store %arg7[%c0_28, %c112], %47 {strides = array<i32>} : memref<1x256xf32, #tpu.memory_space<vmem>>, vector<1x16xf32>,
      %49 = vector.extract_strided_slice %32 {offsets = [8, 0], sizes = [1, 16], strides = [1, 1]} : vector<16x16xf32> to vector<1x16xf32>
      %c0_29 = arith.constant 0 : index
      %c128 = arith.constant 128 : index
      %50 = vector.load %arg7[%c0_29, %c128] : memref<1x256xf32, #tpu.memory_space<vmem>>, vector<1x16xf32>
      tpu.vector_store %arg7[%c0_29, %c128], %49 {strides = array<i32>} : memref<1x256xf32, #tpu.memory_space<vmem>>, vector<1x16xf32>,
      %51 = vector.extract_strided_slice %32 {offsets = [9, 0], sizes = [1, 16], strides = [1, 1]} : vector<16x16xf32> to vector<1x16xf32>
      %c0_30 = arith.constant 0 : index
      %c144 = arith.constant 144 : index
      %52 = vector.load %arg7[%c0_30, %c144] : memref<1x256xf32, #tpu.memory_space<vmem>>, vector<1x16xf32>
      tpu.vector_store %arg7[%c0_30, %c144], %51 {strides = array<i32>} : memref<1x256xf32, #tpu.memory_space<vmem>>, vector<1x16xf32>,
      %53 = vector.extract_strided_slice %32 {offsets = [10, 0], sizes = [1, 16], strides = [1, 1]} : vector<16x16xf32> to vector<1x16xf32>
      %c0_31 = arith.constant 0 : index
      %c160 = arith.constant 160 : index
      %54 = vector.load %arg7[%c0_31, %c160] : memref<1x256xf32, #tpu.memory_space<vmem>>, vector<1x16xf32>
      tpu.vector_store %arg7[%c0_31, %c160], %53 {strides = array<i32>} : memref<1x256xf32, #tpu.memory_space<vmem>>, vector<1x16xf32>,
      %55 = vector.extract_strided_slice %32 {offsets = [11, 0], sizes = [1, 16], strides = [1, 1]} : vector<16x16xf32> to vector<1x16xf32>
      %c0_32 = arith.constant 0 : index
      %c176 = arith.constant 176 : index
      %56 = vector.load %arg7[%c0_32, %c176] : memref<1x256xf32, #tpu.memory_space<vmem>>, vector<1x16xf32>
      tpu.vector_store %arg7[%c0_32, %c176], %55 {strides = array<i32>} : memref<1x256xf32, #tpu.memory_space<vmem>>, vector<1x16xf32>,
      %57 = vector.extract_strided_slice %32 {offsets = [12, 0], sizes = [1, 16], strides = [1, 1]} : vector<16x16xf32> to vector<1x16xf32>
      %c0_33 = arith.constant 0 : index
      %c192 = arith.constant 192 : index
      %58 = vector.load %arg7[%c0_33, %c192] : memref<1x256xf32, #tpu.memory_space<vmem>>, vector<1x16xf32>
      tpu.vector_store %arg7[%c0_33, %c192], %57 {strides = array<i32>} : memref<1x256xf32, #tpu.memory_space<vmem>>, vector<1x16xf32>,
      %59 = vector.extract_strided_slice %32 {offsets = [13, 0], sizes = [1, 16], strides = [1, 1]} : vector<16x16xf32> to vector<1x16xf32>
      %c0_34 = arith.constant 0 : index
      %c208 = arith.constant 208 : index
      %60 = vector.load %arg7[%c0_34, %c208] : memref<1x256xf32, #tpu.memory_space<vmem>>, vector<1x16xf32>
      tpu.vector_store %arg7[%c0_34, %c208], %59 {strides = array<i32>} : memref<1x256xf32, #tpu.memory_space<vmem>>, vector<1x16xf32>,
      %61 = vector.extract_strided_slice %32 {offsets = [14, 0], sizes = [1, 16], strides = [1, 1]} : vector<16x16xf32> to vector<1x16xf32>
      %c0_35 = arith.constant 0 : index
      %c224 = arith.constant 224 : index
      %62 = vector.load %arg7[%c0_35, %c224] : memref<1x256xf32, #tpu.memory_space<vmem>>, vector<1x16xf32>
      tpu.vector_store %arg7[%c0_35, %c224], %61 {strides = array<i32>} : memref<1x256xf32, #tpu.memory_space<vmem>>, vector<1x16xf32>,
      %63 = vector.extract_strided_slice %32 {offsets = [15, 0], sizes = [1, 16], strides = [1, 1]} : vector<16x16xf32> to vector<1x16xf32>
      %c0_36 = arith.constant 0 : index
      %c240 = arith.constant 240 : index
      %64 = vector.load %arg7[%c0_36, %c240] : memref<1x256xf32, #tpu.memory_space<vmem>>, vector<1x16xf32>
      tpu.vector_store %arg7[%c0_36, %c240], %63 {strides = array<i32>} : memref<1x256xf32, #tpu.memory_space<vmem>>, vector<1x16xf32>,
    } else {
    }
    %c0 = arith.constant 0 : index
    %c0_1 = arith.constant 0 : index
    %c0_2 = arith.constant 0 : index
    %3 = vector.load %arg5[%c0, %c0_1, %c0_2] : memref<1x4x256xf32, #tpu.memory_space<vmem>>, vector<1x4x256xf32>
    %4 = vector.shape_cast %3 : vector<1x4x256xf32> to vector<4x256xf32>
    %c0_3 = arith.constant 0 : index
    %c0_4 = arith.constant 0 : index
    %5 = vector.load %arg7[%c0_3, %c0_4] : memref<1x256xf32, #tpu.memory_space<vmem>>, vector<1x256xf32>
    %6 = vector.broadcast %5 : vector<1x256xf32> to vector<4x256xf32>
    %7 = arith.mulf %4, %6 : vector<4x256xf32>
    %c0_5 = arith.constant 0 : index
    %c0_6 = arith.constant 0 : index
    %c0_7 = arith.constant 0 : index
    %8 = vector.load %arg6[%c0_5, %c0_6, %c0_7] : memref<1x4x256xf32, #tpu.memory_space<vmem>>, vector<1x4x256xf32>
    %9 = vector.shape_cast %8 : vector<1x4x256xf32> to vector<4x256xf32>
    %10 = vector.shape_cast %7 : vector<4x256xf32> to vector<1x4x256xf32>
    tpu.vector_store %arg6[%c0_5, %c0_6, %c0_7], %10 {strides = array<i32>} : memref<1x4x256xf32, #tpu.memory_space<vmem>>, vector<1x4x256xf32>,
    return
  }
  func.func @transform_0(%arg0: i32, %arg1: i32) -> (i32, i32, i32) {
    %c0_i32 = arith.constant 0 : i32
    %c0_i32_0 = arith.constant 0 : i32
    %c0_i32_1 = arith.constant 0 : i32
    return %arg0, %c0_i32, %c0_i32_0 : i32, i32, i32
  }
  func.func @transform_1(%arg0: i32, %arg1: i32) -> (i32, i32) {
    %c0_i32 = arith.constant 0 : i32
    %c0_i32_0 = arith.constant 0 : i32
    %c0_i32_1 = arith.constant 0 : i32
    return %c0_i32, %c0_i32_0 : i32, i32
  }
  func.func @transform_2(%arg0: i32, %arg1: i32) -> (i32, i32) {
    %c0_i32 = arith.constant 0 : i32
    %c0_i32_0 = arith.constant 0 : i32
    %c0_i32_1 = arith.constant 0 : i32
    return %c0_i32, %c0_i32_0 : i32, i32
  }
  func.func @transform_3(%arg0: i32, %arg1: i32) -> (i32, i32, i32) {
    %c0_i32 = arith.constant 0 : i32
    %c0_i32_0 = arith.constant 0 : i32
    return %arg0, %arg1, %c0_i32 : i32, i32, i32
  }
  func.func @transform_4(%arg0: i32, %arg1: i32) -> (i32, i32, i32) {
    %c0_i32 = arith.constant 0 : i32
    %c0_i32_0 = arith.constant 0 : i32
    return %arg0, %arg1, %c0_i32 : i32, i32, i32
  }
}

</mosaic_0001>

<bundles_post_ra>
// kernel: tpu_custom_call.1
= control target key start
LH: loop header
LB: loop body
LE: loop exit
PB: predicated region body
PF: predicated region fallthrough
CT: control target
= control target key end

     0   :  { %s1441_s0 = inlined_call_operand.hbm [shape: f32[2,16,16], index: 0, kind: input, shape index: {}]   ;;  %s1442_s1 = inlined_call_operand.hbm [shape: f32[16,16], index: 1, kind: input, shape index: {}]   ;;  %s1443_s2 = inlined_call_operand.hbm [shape: f32[16,16], index: 2, kind: input, shape index: {}]   ;;  %s1444_s3 = inlined_call_operand.hbm [shape: f32[2,4,256], index: 3, kind: input, shape index: {}]   ;;  %s1445_s4 = inlined_call_operand.hbm [shape: f32[2,4,256], index: 4, kind: output, shape index: {}]  }
   0x1   :  { %1454 = sst [smem:[#allocation18_spill]] %s1442_s1 }
   0x2   :  { %1455 = sst [smem:[#allocation19_spill]] %s1443_s2 }
   0x3   :  { %9 = vsyncpa [#allocation4], 0 }
   0x4   :  { %11 = vsyncpa [#allocation4 + $0x1], 0 }
   0x5   :  { %12 = vsyncpa [#allocation7], 0 }
   0x6   :  { %13 = vsyncpa [#allocation10], 0 }
   0x7   :  { %15 = vsyncpa [#allocation10 + $0x1], 0 }
   0x8   :  { %16 = vsyncpa [#allocation5], 0 }
   0x9   :  { %18 = vsyncpa [#allocation5 + $0x1], 0  ;;  %s1098_s15 = smov 0   ;;  %s1100_s16 = smov 0  }
   0xa   :  { %s1102_s17 = smov 0   ;;  %s1104_s18 = smov 0  }
   0xb   :  { %s1106_s19 = smov 0   ;;  %s1108_s20 = smov 0  }
   0xc LB: > { %s711_s21 = sadd.s32 4294967295, %s1060_s20   ;;  %s712_s22 = sadd.s32 4294967294, %s1060_s20   ;;  %s1060_s20 = sphi %s1108_s20, %s24_s20   ;;  %s1056_s19 = sphi %s1106_s19, %s1504_s19   ;;  %s1052_s18 = sphi %s1104_s18, %s1503_s18   ;;  %s1048_s17 = sphi %s1102_s17, %s1502_s17   ;;  %s1044_s16 = sphi %s1100_s16, %s1501_s16   ;;  %s1040_s15 = sphi %s1098_s15, %s1500_s15  }
   0xd   : > { %p56_p0 = scmp.ne.s32.totalorder %s1044_s16, %s1040_s15  ;;  %p1132_p1 = scmp.eq.s32.totalorder %s711_s21, 0 }
   0xe   : > { %p1136_p2 = scmp.eq.s32.totalorder %s711_s21, 1  ;;  %p158_p3 = scmp.eq.s32.totalorder %s712_s22, 1 }
   0xf   : > { %p1142_p4 = por %p1132_p1, %p56_p0  ;;  %p713_p5 = scmp.ge.s32.totalorder %s1060_s20, 1 }
  0x10   : > { %p1147_p6 = por %p158_p3, %p56_p0  ;;  %p165_p7 = scmp.lt.s32.totalorder %s1060_s20, 3 }
  0x11   : > { %s1460_s1 = sld [smem:[#allocation18_spill]]  ;;  %s1062_s5 = smov [#allocation6]  }
  0x12   : > { %p1155_p8 = pnand %p713_p5, %p165_p7  ;;  %s178_s6 = sshll.u32 %s1062_s5, 4  ;;  %s179_s6 = int_to_ptr.vmem [resolvable:$true] %s178_s6 }
  0x13   : > { %p716_p11 = scmp.ge.s32.totalorder %s1060_s20, 2  ;;  %s1462_s2 = sld [smem:[#allocation19_spill]] }
  0x14   : > { %p765_p9 = pneg %p1155_p8  ;;  %s1446_s10 = smov 128  }
  0x15   : > { %s1447_s11 = smov 8   ;;  %s1065_s12 = smov [#allocation8]  }
  0x16   : > { %p766_p10 = pnand %p765_p9, %p1132_p1  ;;  %s192_s13 = sshll.u32 %s1065_s12, 4  ;;  %s193_s13 = int_to_ptr.vmem [resolvable:$true] %s192_s13 }
  0x17   : > { %s176_s29 = sshll.u32 %s1460_s1, 4  ;;  %s36_s14 = sadd.s32 1, %s1056_s19  ;;  %s177_s29 = int_to_ptr.hbm [resolvable:$true] %s176_s29 }
  0x18   : > { %768 = dma.hbm_to_vmem [thread:$0]  (!%p766_p10), %s177_s29, 256, %s179_s6, [#allocation7], %s1446_s10, %s1446_s10, %s1447_s11  }
  0x19   : > { %s190_s9 = sshll.u32 %s1462_s2, 4  ;;  %s43_s21 = sadd.s32 1, %s1048_s17  ;;  %s191_s9 = int_to_ptr.hbm [resolvable:$true] %s190_s9 }
  0x1a   : > { %771 = dma.hbm_to_vmem [thread:$0]  (!%p766_p10), %s191_s9, 256, %s193_s13, [#allocation7], %s1446_s10, %s1446_s10, %s1447_s11  }
  0x1b   : > { %p38_p12 = scmp.ge.s32.totalorder %s36_s14, 2  ;;  %p50_p13 = scmp.ne.s32.totalorder %s1048_s17, %s1044_s16 }
  0x1c   : > { %p51_p0 = scmp.eq.s32.totalorder %s1060_s20, 0  ;;  %p785_p3 = scmp.lt.s32.totalorder %s1060_s20, 2 }
  0x1d   : > { %s1506_s14 = smov (%p38_p12, %s36_s14), 0  ;;  %p1187_p7 = por %p1136_p2, %p50_p13 }
  0x1e   : > { %1463 = sst [smem:[#allocation16_spill]] %s1506_s14  ;;  %p1181_p5 = por %p51_p0, %p50_p13 }
  0x1f   : > { %s40_s28 = ssub.s32 %s1056_s19, %s1506_s14  ;;  %s206_s29 = sand.u32 1, %s1048_s17  }
  0x20   : > { %p41_p9 = scmp.eq.s32.totalorder %s40_s28, 0  ;;  %s717_s5 = sshll.u32 %s206_s29, 4 }
  0x21   : > { %s738_s6 = sshll.u32 %s1056_s19, 4  ;;  %s210_s10 = scalar_lea.vmem [#allocation3], %s717_s5 }
  0x22   : > { %s1196_s7 = scalar_select %p41_p9, %s1048_s17, %s43_s21  }
  0x23   : > { %s215_s12 = scalar_lea.hbm %s1441_s0, %s738_s6  ;;  %s218_s24 = sshll.u32 %s210_s10, 4  ;;  %s219_s24 = int_to_ptr.vmem [resolvable:$true] %s218_s24 }
  0x24   : > { %1466 = sst [smem:[#allocation17_spill]] %s1196_s7  ;;  %s216_s13 = sshll.u32 %s215_s12, 4  ;;  %s217_s13 = int_to_ptr.hbm [resolvable:$true] %s216_s13 }
  0x25   : > { %p773_p2 = pnand %p785_p3, %p1181_p5  ;;  %s720_s11 = sshll.u32 %s206_s29, 3 }
  0x26   : > { %s739_s1 = sshll.u32 %s1056_s19, 3  ;;  %s207_s2 = scalar_lea.sflag [#allocation4], %s206_s29 }
  0x27   : > { %s1467_s28 = smov 8   ;;  %s1468_s14 = smov 128  }
  0x28   : > { %775 = dma.hbm_to_vmem [thread:$0]  (!%p773_p2), %s217_s13, 256, %s219_s24, %s207_s2, %s1468_s14, %s1468_s14, %s1467_s28  }
  0x29   : > { %s239_s8 = scalar_lea.hbm %s1444_s3, %s739_s1  ;;  %s232_s6 = scalar_lea.vmem [#allocation9], %s720_s11 }
  0x2a   : > { %s243_s9 = sshll.u32 %s232_s6, 4  ;;  %s241_s5 = sshll.u32 %s239_s8, 4  ;;  %s244_s9 = int_to_ptr.vmem [resolvable:$true] %s243_s9  ;;  %s242_s5 = int_to_ptr.hbm [resolvable:$true] %s241_s5 }
  0x2b   : > { %s229_s10 = scalar_lea.sflag [#allocation10], %s206_s29  ;;  %252 = sbr.rel (%p1155_p8) target bundleno = 830 (0x33e), region = 36 }
  0x2c   : > { %778 = dma.hbm_to_vmem [thread:$0]  (!%p773_p2), %s242_s5, 128, %s244_s9, %s229_s10  }
  0x2d   : > { %s1215_s22 = sand.u32 (!%p1155_p8), 1, %s1044_s16  }
  0x2e   : > { %s724_s2 = sshll.u32 (!%p1155_p8), %s1215_s22, 4  ;;  %s255_s14 = scalar_lea.sflag (!%p1155_p8), [#allocation4], %s1215_s22 }
  0x2f   : > { %s258_s7 = scalar_lea.vmem (!%p1155_p8), [#allocation3], %s724_s2 }
  0x30   : > { %1023 = dma.done.wait (%p1142_p4), %s255_s14, 256  }
  0x31   : > { %1025 = vsyncadd (%p1142_p4), %s255_s14, 4294967040 }
  0x32   : > { %1027 = dma.done.wait (%p1132_p1), [#allocation7], 512  }
  0x33   : > { %1029 = vsyncadd (%p1132_p1), [#allocation7], 4294966784  ;;  %s727_s1 = sshll.u32 %s1215_s22, 3  ;;  %s275_s30 = scalar_lea.sflag [#allocation10], %s1215_s22 }
  0x34   : > { %s1231_s11 = scalar_lea.vmem [#allocation9], %s727_s1 }
  0x35   : > { %1031 = dma.done.wait (%p1142_p4), %s275_s30, 128  }
  0x36   : > { %1033 = vsyncadd (%p1142_p4), %s275_s30, 4294967168  ;;  %v316_v0 = vld [vmem:[#allocation8 + $0x8] sm:$0xff]  ;;  %v315_v1 = vld [vmem:[#allocation8] sm:$0xff]  ;;  %vm317_vm0 = vcmask 130048   ;;  %v428_v44 = vlaneseq  ;;  %s1066_s24 = smov 16   ;;  %s1067_s28 = smov 32  }
  0x37   : > { %741 = vmatpush.msra.mxu2 %v316_v0  ;;  %v1237_v2 = vld [vmem:[%s258_s7 + $0x8] sm:$0xff]  ;;  %338 = vmatpush.msra.mxu0 %v316_v0  ;;  %v1239_v3 = vld [vmem:[%s258_s7] sm:$0xff]  ;;  %s1068_s21 = smov 48   ;;  %s1069_s8 = smov 64  }
  0x38   : > { %v348_v6 = vld [vmem:[#allocation6 + $0x8] sm:$0xff]  ;;  %v347_v7 = vld [vmem:[#allocation6] sm:$0xff]  ;;  %vm430_vm5 = vcmp.lt.s32.totalorder %v428_v44, 16  ;;  %s1070_s6 = smov 80   ;;  %s1071_s9 = smov 96   ;;  %vm1255_vm6 = vcmp.ge.s32.totalorder %v428_v44, 16 }
  0x39   : > { %742 = vmatpush.msra.mxu2 %v315_v1  ;;  %339 = vmatpush.msra.mxu0 %v315_v1  ;;  %s1072_s5 = smov 112   ;;  %vm1260_vm7 = vcmp.lt.s32.totalorder %v428_v44, 32  ;;  %vm1265_vm8 = vcmp.ge.s32.totalorder %v428_v44, 32  ;;  %vm1270_vm9 = vcmp.lt.s32.totalorder %v428_v44, 48  ;;  %vm1293_vm12 = vcmp.ge.s32.totalorder %v428_v44, 48  ;;  %s740_s10 = sshll.u32 %s1052_s18, 3 }
  0x3a   : > { %730 = vmatmul.msk.f32.vlgmr.msra.gmra.mxu2 %vm317_vm0, %v1237_v2  ;;  %729 = vmatmul.msk.f32.vlgmr.msra.gmra.mxu0 %vm317_vm0, %v1239_v3  ;;  %vm1450_vm10 = vmand %vm1255_vm6, %vm1260_vm7  ;;  %vm1298_vm13 = vcmp.lt.s32.totalorder %v428_v44, 64  ;;  %vm1303_vm14 = vcmp.ge.s32.totalorder %v428_v44, 64  ;;  %vm1308_vm15 = vcmp.lt.s32.totalorder %v428_v44, 80  ;;  %s580_s7 = scalar_lea.hbm %s1445_s4, %s740_s10  ;;  %s308_s30 = scalar_lea.vmem [#allocation11], %s727_s1 }
  0x3b   : > { %vm1449_vm11 = vmand %vm1265_vm8, %vm1270_vm9  ;;  %s567_s18 = scalar_lea.sflag [#allocation5], %s1215_s22 }
  0xb7   : > { %v341_v5 = vpop.f32.mrf.mxu0 }
  0xbd   : > { %v344_v4 = vpop.f32.mrf.mxu2 }
  0xbe   : > { %369 = vmatpush.msra.mxu1 %v344_v4  ;;  %743 = vmatpush.msra.mxu3 %v344_v4 }
  0xc0   : > { %370 = vmatpush.msra.mxu1 %v341_v5  ;;  %744 = vmatpush.msra.mxu3 %v341_v5 }
  0xc1   : > { %732 = vmatmul.msk.f32.vlgmr.msra.gmra.mxu3 %vm317_vm0, %v348_v6  ;;  %731 = vmatmul.msk.f32.vlgmr.msra.gmra.mxu1 %vm317_vm0, %v347_v7 }
 0x13e   : > { %v372_v8 = vpop.f32.mrf.mxu1 }
 0x13f   : > { %v378_v9 = vsel %vm317_vm0, %v372_v8, inf  ;;  %v390_v13 = vsel %vm317_vm0, %v372_v8, -inf }
 0x144   : > { %v375_v10 = vpop.f32.mrf.mxu3 }
 0x145   : > { %v379_v11 = vsel %vm317_vm0, %v375_v10, inf  ;;  %v391_v14 = vsel %vm317_vm0, %v375_v10, -inf  ;;  %vm1313_vm0 = vcmp.ge.s32.totalorder %v428_v44, 80 }
 0x146   : > { %v380_v12 = vmin.f32 %v378_v9, %v379_v11  ;;  %v392_v15 = vmax.f32 %v390_v13, %v391_v14 }
 0x148   : > { %381 = vmin.xlane.f32.xlu0 %v380_v12 }
 0x150   : > { %393 = vmax.xlane.f32.xlu0 %v392_v15 }
 0x1bb   : > { %v382_v16 = vpop.xlane.xlu0 %381 }
 0x1bc   : > { %v383_v17 = vrot.slane %v382_v16, 4 }
 0x1be   : > { %v384_v18 = vmin.f32 %v382_v16, %v383_v17 }
 0x1c0   : > { %v385_v19 = vrot.slane %v384_v18, 2 }
 0x1c2   : > { %v386_v20 = vmin.f32 %v384_v18, %v385_v19 }
 0x1c3   : > { %v394_v21 = vpop.xlane.xlu0 %393 }
 0x1c4   : > { %v395_v22 = vrot.slane %v394_v21, 4  ;;  %v387_v23 = vrot.slane %v386_v20, 1 }
 0x1c6   : > { %v396_v24 = vmax.f32 %v394_v21, %v395_v22  ;;  %v388_v25 = vmin.f32 %v386_v20, %v387_v23 }
 0x1c8   : > { %v397_v26 = vrot.slane %v396_v24, 2  ;;  %745 = vpush %v388_v25 }
 0x1ca   : > { %v398_v27 = vmax.f32 %v396_v24, %v397_v26 }
 0x1cc   : > { %v399_v28 = vrot.slane %v398_v27, 1 }
 0x1ce   : > { %v400_v29 = vmax.f32 %v398_v27, %v399_v28  ;;  %v555_v28 = vld [vmem:[%s1231_s11] sm:$0xff] }
 0x1d0   : > { %747 = vpush %v400_v29 }
 0x1f9   : > { %s746_s23 = spop %745 }
 0x1fa   : > { %v402_v41 = vstv %s746_s23 }
 0x1fb   : > { %v403_v42 = vsub.f32 %v372_v8, %v402_v41  ;;  %v404_v43 = vsub.f32 %v375_v10, %v402_v41 }
 0x201   : > { %s748_s25 = spop %747 }
 0x202   : > { %s405_s29 = ssub.f32 %s748_s25, %s746_s23  ;;  %s582_s23 = sshll.u32 %s308_s30, 4  ;;  %s583_s23 = int_to_ptr.vmem [resolvable:$true] %s582_s23 }
 0x203   : > { %s584_s25 = sshll.u32 %s580_s7, 4  ;;  %s585_s25 = int_to_ptr.hbm [resolvable:$true] %s584_s25 }
 0x204   : > { %s406_s12 = sadd.f32 1e-08, %s405_s29  ;;  %s984_s29 = sshra.s32 %s585_s25, 4  ;;  %s985_s29 = int_to_ptr.hbm [resolvable:$true] %s984_s29 }
 0x205   : > { %p991_p10 = scmp.lt.s32.totalorder %s985_s29, %s1445_s4 }
 0x206   : > { %v407_v30 = vstv %s406_s12  ;;  %s986_s12 = scalar_lea.hbm %s985_s29, 8 }
 0x207   : > { %848 = vrcp.f32 %v407_v30  ;;  %v419_v34 = vand.u32 2147483648, %v407_v30  ;;  %v417_v36 = vand.u32 2147483647, %v407_v30  ;;  %vm413_vm2 = vweird.f32 %v407_v30  ;;  %p987_p1 = scmp.ne.s32.totalorder %s985_s29, %s986_s12 }
 0x209   : > { %v420_v38 = vor.u32 1.1754944e-38, %v419_v34  ;;  %vm418_vm4 = vcmp.eq.f32.partialorder %v417_v36, 8.507059e+37  ;;  %p988_p4 = pnand %p987_p1, %p1187_p7 }
 0x20b   : > { %p989_p8 = pneg %p988_p4 }
 0x20d   : > { %v849_v31 = vpop.eup %848 }
 0x20e   : > { %v409_v32 = vmul.f32 %v849_v31, %v407_v30  ;;  %vm414_vm1 = vweird.f32 %v849_v31 }
 0x20f   : > { %vm415_vm3 = vmor %vm413_vm2, %vm414_vm1  ;;  %vm1318_vm1 = vcmp.lt.s32.totalorder %v428_v44, 96 }
 0x210   : > { %v410_v33 = vsub.f32 1.0, %v409_v32  ;;  %vm1452_vm2 = vmand %vm1293_vm12, %vm1298_vm13 }
 0x212   : > { %v411_v35 = vmul.f32 %v849_v31, %v410_v33 }
 0x214   : > { %v412_v37 = vadd.f32 %v849_v31, %v411_v35 }
 0x216   : > { %v416_v39 = vsel %vm415_vm3, %v849_v31, %v412_v37  ;;  %vm1327_vm3 = vcmp.ge.s32.totalorder %v428_v44, 96 }
 0x217   : > { %v421_v40 = vsel %vm418_vm4, %v420_v38, %v416_v39  ;;  %vm1332_vm4 = vcmp.lt.s32.totalorder %v428_v44, 112 }
 0x218   : > { %749 = vpush %v421_v40 }
 0x249   : > { %s750_s13 = spop %749 }
 0x24a   : > { %v423_v45 = vstv %s750_s13 }
 0x24b   : > { %v424_v46 = vmul.f32 %v423_v45, %v403_v42  ;;  %v425_v47 = vmul.f32 %v423_v45, %v404_v43 }
 0x24d   : > { %v426_v48 = vmax.f32 %v424_v46, %v1239_v3  ;;  %v427_v49 = vmax.f32 %v425_v47, %v1237_v2 }
 0x24f   : > { %434 = vst [vmem:[#allocation1] sm:$0xff] %v426_v48 }
 0x250   : > { %432 = vst.msk [vmem:[#allocation2] sm:$0x1] %vm430_vm5, %v426_v48 }
 0x251   : > { %504 = vst.msk [vmem:[#allocation2 + $0x1] sm:$0x1] %vm430_vm5, %v427_v49  ;;  %vm1451_vm5 = vmand %vm1303_vm14, %vm1308_vm15 }
 0x256   : > { %v436_v50 = vld [vmem:[#allocation1 + $0x1] ss:$9 sm:$0xff] }
 0x257   : > { %444 = vst [vmem:[#allocation1] sm:$0xff] %v426_v48  ;;  %437 = vrot.lane.b32.xlu1 %v436_v50, %s1066_s24 }
 0x25e   : > { %v446_v51 = vld [vmem:[#allocation1 + $0x2] ss:$9 sm:$0xff] }
 0x25f   : > { %454 = vst [vmem:[#allocation1] sm:$0xff] %v426_v48  ;;  %447 = vrot.lane.b32.xlu2 %v446_v51, %s1067_s28 }
 0x266   : > { %v456_v52 = vld [vmem:[#allocation1 + $0x3] ss:$9 sm:$0xff] }
 0x267   : > { %464 = vst [vmem:[#allocation1] sm:$0xff] %v426_v48  ;;  %457 = vrot.lane.b32.xlu0 %v456_v52, %s1068_s21 }
 0x26e   : > { %v466_v53 = vld [vmem:[#allocation1 + $0x4] ss:$9 sm:$0xff] }
 0x26f   : > { %467 = vrot.lane.b32.xlu2 %v466_v53, %s1069_s8  ;;  %474 = vst [vmem:[#allocation1] sm:$0xff] %v426_v48 }
 0x276   : > { %v476_v54 = vld [vmem:[#allocation1 + $0x5] ss:$9 sm:$0xff] }
 0x277   : > { %477 = vrot.lane.b32.xlu2 %v476_v54, %s1070_s6  ;;  %484 = vst [vmem:[#allocation1] sm:$0xff] %v426_v48 }
 0x27e   : > { %v486_v55 = vld [vmem:[#allocation1 + $0x6] ss:$9 sm:$0xff] }
 0x27f   : > { %487 = vrot.lane.b32.xlu2 %v486_v55, %s1071_s9  ;;  %494 = vst [vmem:[#allocation1] sm:$0xff] %v426_v48 }
 0x286   : > { %v496_v56 = vld [vmem:[#allocation1 + $0x7] ss:$9 sm:$0xff] }
 0x287   : > { %506 = vst [vmem:[#allocation1] sm:$0xff] %v427_v49 }
 0x28e   : > { %v508_v57 = vld [vmem:[#allocation1 + $0x1] ss:$9 sm:$0xff] }
 0x28f   : > { %509 = vrot.lane.b32.xlu1 %v508_v57, %s1066_s24  ;;  %513 = vst [vmem:[#allocation1] sm:$0xff] %v427_v49  ;;  %s990_s24 = scalar_lea.hbm %s1445_s4, 16 }
 0x290   : > { %p992_p12 = scmp.lt.s32.totalorder %s990_s24, %s986_s12 }
 0x292   : > { %p993_p13 = por %p992_p12, %p991_p10 }
 0x294   : > { %p994_p0 = pnand %p993_p13, %p989_p8 }
 0x296   : > { %v515_v58 = vld [vmem:[#allocation1 + $0x2] ss:$9 sm:$0xff] }
 0x297   : > { %516 = vrot.lane.b32.xlu2 %v515_v58, %s1067_s28  ;;  %520 = vst [vmem:[#allocation1] sm:$0xff] %v427_v49 }
 0x29e   : > { %v522_v59 = vld [vmem:[#allocation1 + $0x3] ss:$9 sm:$0xff] }
 0x29f   : > { %523 = vrot.lane.b32.xlu1 %v522_v59, %s1068_s21  ;;  %527 = vst [vmem:[#allocation1] sm:$0xff] %v427_v49 }
 0x2a6   : > { %v529_v60 = vld [vmem:[#allocation1 + $0x4] ss:$9 sm:$0xff] }
 0x2a7   : > { %530 = vrot.lane.b32.xlu1 %v529_v60, %s1069_s8  ;;  %534 = vst [vmem:[#allocation1] sm:$0xff] %v427_v49 }
 0x2ae   : > { %v536_v61 = vld [vmem:[#allocation1 + $0x5] ss:$9 sm:$0xff] }
 0x2af   : > { %537 = vrot.lane.b32.xlu1 %v536_v61, %s1070_s6  ;;  %541 = vst [vmem:[#allocation1] sm:$0xff] %v427_v49 }
 0x2b6   : > { %v543_v62 = vld [vmem:[#allocation1 + $0x6] ss:$9 sm:$0xff] }
 0x2b7   : > { %497 = vrot.lane.b32.xlu1 %v496_v56, %s1072_s5  ;;  %544 = vrot.lane.b32.xlu0 %v543_v62, %s1071_s9  ;;  %548 = vst [vmem:[#allocation1] sm:$0xff] %v427_v49 }
 0x2b9   : > { %v448_v0 = vpop.permute.xlu2 %447 }
 0x2be   : > { %v550_v63 = vld [vmem:[#allocation1 + $0x7] ss:$9 sm:$0xff] }
 0x2bf   : > { %551 = vrot.lane.b32.xlu2 %v550_v63, %s1072_s5 }
 0x2c9   : > { %v438_v5 = vpop.permute.xlu1 %437  ;;  %v468_v6 = vpop.permute.xlu2 %467 }
 0x2ca   : > { %443 = vst.msk [vmem:[#allocation2] sm:$0x1] %vm1450_vm10, %v438_v5  ;;  %vm1453_vm10 = vmand %vm1327_vm3, %vm1332_vm4 }
 0x2cb   : > { %453 = vst.msk [vmem:[#allocation2] sm:$0x1] %vm1449_vm11, %v448_v0  ;;  %vm482_vm11 = vmand %vm1313_vm0, %vm1318_vm1 }
 0x2d1   : > { %v478_v7 = vpop.permute.xlu2 %477 }
 0x2d9   : > { %v458_v16 = vpop.permute.xlu0 %457  ;;  %v488_v17 = vpop.permute.xlu2 %487 }
 0x2da   : > { %463 = vst.msk [vmem:[#allocation2] sm:$0x1] %vm1452_vm2, %v458_v16  ;;  %vm1494_vm2 = vmand %vm1265_vm8, %vm1270_vm9  ;;  %vm501_vm8 = vcmp.lt.s32.totalorder %v428_v44, 128 }
 0x2db   : > { %473 = vst.msk [vmem:[#allocation2] sm:$0x1] %vm1451_vm5, %v468_v6  ;;  %vm1493_vm5 = vmand %vm1255_vm6, %vm1260_vm7  ;;  %vm500_vm7 = vcmp.ge.s32.totalorder %v428_v44, 112 }
 0x2dc   : > { %483 = vst.msk [vmem:[#allocation2] sm:$0x1] %vm482_vm11, %v478_v7  ;;  %vm1496_vm6 = vmand %vm1303_vm14, %vm1308_vm15 }
 0x2dd   : > { %493 = vst.msk [vmem:[#allocation2] sm:$0x1] %vm1453_vm10, %v488_v17  ;;  %vm1495_vm10 = vmand %vm1293_vm12, %vm1298_vm13 }
 0x2de   : > { %vm502_vm9 = vmand %vm500_vm7, %vm501_vm8 }
 0x2f1   : > { %v517_v19 = vpop.permute.xlu2 %516 }
 0x301   : > { %v510_v18 = vpop.permute.xlu1 %509 }
 0x302   : > { %512 = vst.msk [vmem:[#allocation2 + $0x1] sm:$0x1] %vm1493_vm5, %v510_v18 }
 0x303   : > { %519 = vst.msk [vmem:[#allocation2 + $0x1] sm:$0x1] %vm1494_vm2, %v517_v19 }
 0x311   : > { %v524_v20 = vpop.permute.xlu1 %523 }
 0x312   : > { %526 = vst.msk [vmem:[#allocation2 + $0x1] sm:$0x1] %vm1495_vm10, %v524_v20  ;;  %vm1497_vm10 = vmand %vm1327_vm3, %vm1332_vm4 }
 0x319   : > { %v531_v21 = vpop.permute.xlu1 %530  ;;  %v552_v25 = vpop.permute.xlu2 %551 }
 0x31a   : > { %533 = vst.msk [vmem:[#allocation2 + $0x1] sm:$0x1] %vm1496_vm6, %v531_v21 }
 0x321   : > { %v538_v22 = vpop.permute.xlu1 %537 }
 0x322   : > { %540 = vst.msk [vmem:[#allocation2 + $0x1] sm:$0x1] %vm482_vm11, %v538_v22  ;;  %vm561_vm11 = vcmask 1043456  }
 0x329   : > { %v498_v23 = vpop.permute.xlu1 %497  ;;  %v545_v24 = vpop.permute.xlu0 %544 }
 0x32a   : > { %503 = vst.msk [vmem:[#allocation2] sm:$0x1] %vm502_vm9, %v498_v23 }
 0x32b   : > { %547 = vst.msk [vmem:[#allocation2 + $0x1] sm:$0x1] %vm1497_vm10, %v545_v24 }
 0x32c   : > { %554 = vst.msk [vmem:[#allocation2 + $0x1] sm:$0x1] %vm502_vm9, %v552_v25 }
 0x333   : > { %v556_v26 = vld [vmem:[#allocation2] sm:$0x3] }
 0x334   : > { %v559_v27 = vperm.slane %v556_v26, 1  ;;  %v558_v29 = vperm.slane %v556_v26, 0 }
 0x336   : > { %v560_v30 = vrot.slane %v559_v27, 4 }
 0x338   : > { %v562_v31 = vsel %vm561_vm11, %v558_v29, %v560_v30 }
 0x339   : > { %v564_v32 = vmul.f32 %v562_v31, %v555_v28 }
 0x33b   : > { %565 = vst [vmem:[%s308_s30] sm:$0xff] %v564_v32 }
 0x33c   : > { %997 = shalt.err (!%p994_p0)
}
 0x33d   : > { %763 = dma.vmem_to_hbm [thread:$0]  (%p1187_p7), %s583_s23, 128, %s585_s25, %s567_s18  }
 0x33e PF: > { %s596_s22 = sand.u32 1, %s1040_s15   ;;  %p780_p3 = pnand %p716_p11, %p1147_p6 }
 0x33f   : > { %s597_s21 = scalar_lea.sflag [#allocation5], %s596_s22 }
 0x340   : > { %p781_p5 = pneg %p780_p3 }
 0x342   : > { %1035 = dma.done.wait (%p781_p5), %s597_s21, 128  }
 0x343   : > { %1037 = vsyncadd (%p781_p5), %s597_s21, 4294967168  ;;  %s24_s20 = sadd.s32 1, %s1060_s20   ;;  %s1498_s8 = sld [smem:[#allocation17_spill]] }
 0x344   : > { %p21_p9 = scmp.ge.s32.totalorder %s24_s20, 4   ;;  %s1499_s27 = sld [smem:[#allocation16_spill]] }
 0x345   : > { %s1500_s15 = smov %s1044_s16  ;;  %s1501_s16 = smov %s1048_s17 }
 0x346   : > { %s1503_s18 = smov %s1056_s19  ;;  %23 = sbr.rel (!%p21_p9) target bundleno = 12 (0xc), region = 120 }
 0x349   : > { %s1502_s17 = smov %s1498_s8 }
 0x34a   : > { %s1504_s19 = smov %s1499_s27 }
 0x34b   :  { %603 = vsyncpa [#allocation4], 1 }
 0x34c   :  { %605 = vsyncpa [#allocation4 + $0x1], 1 }
 0x34d   :  { %606 = vsyncpa [#allocation7], 1 }
 0x34e   :  { %607 = vsyncpa [#allocation10], 1 }
 0x34f   :  { %609 = vsyncpa [#allocation10 + $0x1], 1 }
 0x350   :  { %610 = vsyncpa [#allocation5], 1 }
 0x351   :  { %612 = vsyncpa [#allocation5 + $0x1], 1 }

</bundles_post_ra>
